<compile_context>
chip_gen: v7x
topology: tpu7x:2x2x1
jax: 0.10.0
libtpu: 0.0.40
codegen_flags: <defaults>
</compile_context>

<pallas_src>
import functools

import jax
import jax.numpy as jnp
from jax import lax
from jax.experimental import pallas as pl
from jax.experimental.pallas import tpu as pltpu


def mlp_kernel(x_ref, w1_ref, b1_ref, w2_ref, b2_ref, w3_ref, b3_ref, o_ref,
               *, chunk, compute_dtype, out_on_vpu):
    # Tiny resident weights: loaded once per grid step, reused by every chunk.
    w1 = w1_ref[...]          # (D, H)   compute_dtype
    w2 = w2_ref[...]          # (H, H2)  compute_dtype
    w3 = w3_ref[...]          # (OUT, H2) f32 if out_on_vpu else (H2, OUT) compute_dtype
    b1 = b1_ref[...]          # (1, H)   f32
    b2 = b2_ref[...]          # (1, H2)  f32
    b3 = b3_ref[...]          # (1, OUT) f32

    def compute(xc):
        # Layer 1: Linear + ReLU, f32 accumulate (cast of x happens here, on-chip).
        h1 = jnp.dot(xc.astype(compute_dtype), w1,
                     preferred_element_type=jnp.float32) + b1
        h1 = jnp.maximum(h1, 0.0)
        # Dropout (eval mode) == identity.
        # Layer 2: Linear + ReLU.
        h2 = jnp.dot(h1.astype(compute_dtype), w2,
                     preferred_element_type=jnp.float32) + b2
        h2 = jnp.maximum(h2, 0.0)
        # Layer 3: tiny output head.
        if out_on_vpu:
            # N is tiny (e.g. 4): a padded MXU pass would waste ~a full tile.
            # Do OUT broadcast-multiplies (VPU) + lane reduces (XLU) instead.
            cols = [jnp.sum(h2 * w3[j:j + 1, :], axis=-1, keepdims=True)
                    for j in range(w3.shape[0])]
            out = jnp.concatenate(cols, axis=-1) + b3
        else:
            out = jnp.dot(h2.astype(compute_dtype), w3,
                          preferred_element_type=jnp.float32) + b3
        return out.astype(o_ref.dtype)

    tb = x_ref.shape[0]
    n_chunks = tb // chunk
    if n_chunks <= 1:
        o_ref[...] = compute(x_ref[...])
    else:
        def body(c, carry):
            r = pl.multiple_of(c * chunk, chunk)
            o_ref[pl.ds(r, chunk), :] = compute(x_ref[pl.ds(r, chunk), :])
            return carry
        lax.fori_loop(0, n_chunks, body, 0, unroll=(n_chunks <= 8))


@functools.partial(jax.jit, static_argnames=("block_batch", "compute_dtype"))
def enhanced_tabular_mlp(x, params, *, block_batch=8192,
                         compute_dtype=jnp.bfloat16):
    """Fused 3-layer MLP forward pass, batch-tiled in a single Pallas kernel.

    x: (B, input_dim) float32
    params: dict of w1,b1,w2,b2,w3,b3 with weights stored as (in, out).
    block_batch: max batch tile size (rounded to a multiple of 256).
    compute_dtype: dtype fed to the MXU (bf16 default, f32 optional);
                   accumulation and bias adds are always f32.
    """
    w1, b1 = params["w1"], params["b1"]
    w2, b2 = params["w2"], params["b2"]
    w3, b3 = params["w3"], params["b3"]

    B, D = x.shape
    H = w1.shape[1]
    H2 = w2.shape[1]
    OUT = w3.shape[1]

    # ---- Batch tile / inner chunk selection -------------------------------
    CHUNK = 256
    block_batch = max(CHUNK, (int(block_batch) // CHUNK) * CHUNK)
    if B <= CHUNK:
        TB = B            # full-dim block (satisfies the (8,128) rule)
        chunk = B
    else:
        # Keep >= 2 grid tiles so v7x's two TensorCores both get work
        # (no-op on v5e/v6e), tiles a multiple of 256, capped at block_batch.
        half = -(-B // 2)
        half_r = -(-half // CHUNK) * CHUNK
        TB = max(CHUNK, min(block_batch, half_r))
        chunk = CHUNK
    n_tiles = pl.cdiv(B, TB)   # ragged last tile is masked by Pallas; no jnp.pad

    # ---- Resident operands (tiny; cast in the wrapper) --------------------
    out_on_vpu = OUT <= 8
    w1_c = w1.astype(compute_dtype)
    w2_c = w2.astype(compute_dtype)
    if out_on_vpu:
        w3_k = w3.astype(jnp.float32).T      # (OUT, H2): lane-aligned rows for VPU
    else:
        w3_k = w3.astype(compute_dtype)      # (H2, OUT): MXU path
    b1_f = b1.astype(jnp.float32).reshape(1, H)
    b2_f = b2.astype(jnp.float32).reshape(1, H2)
    b3_f = b3.astype(jnp.float32).reshape(1, OUT)

    cost = pl.CostEstimate(
        flops=2 * B * (D * H + H * H2 + H2 * OUT),
        transcendentals=0,
        bytes_accessed=(B * D * 4 + B * OUT * 4
                        + w1_c.size * w1_c.dtype.itemsize
                        + w2_c.size * w2_c.dtype.itemsize
                        + w3_k.size * w3_k.dtype.itemsize
                        + (H + H2 + OUT) * 4),
    )

    # Weights/biases: constant index_map -> DMA'd once, resident in VMEM while
    # x / out stream through the batch grid (double-buffered by Pallas).
    resident = lambda shape: pl.BlockSpec(shape, lambda i: (0,) * len(shape))

    kernel = functools.partial(mlp_kernel, chunk=chunk,
                               compute_dtype=compute_dtype,
                               out_on_vpu=out_on_vpu)

    return pl.pallas_call(
        kernel,
        out_shape=jax.ShapeDtypeStruct((B, OUT), jnp.float32),
        grid_spec=pltpu.PrefetchScalarGridSpec(
            num_scalar_prefetch=0,
            grid=(n_tiles,),
            in_specs=[
                pl.BlockSpec((TB, D), lambda i: (i, 0)),   # streamed x (f32)
                resident(w1_c.shape), resident(b1_f.shape),
                resident(w2_c.shape), resident(b2_f.shape),
                resident(w3_k.shape), resident(b3_f.shape),
            ],
            out_specs=pl.BlockSpec((TB, OUT), lambda i: (i, 0)),
        ),
        compiler_params=pltpu.CompilerParams(
            dimension_semantics=("parallel",),   # megacore sharding on v7x
        ),
        cost_estimate=cost,
    )(x, w1_c, b1_f, w2_c, b2_f, w3_k, b3_f)


def init_params(key, input_dim, hidden_dim=128):
    """Deterministic parameter init mimicking nn.Linear defaults (uniform)."""
    h2 = hidden_dim // 2
    keys = jax.random.split(key, 6)

    def linear(kw, kb, fan_in, fan_out):
        bound = 1.0 / jnp.sqrt(fan_in)
        # stored as (in, out) so kernel does x @ W
        w = jax.random.uniform(kw, (fan_in, fan_out), jnp.float32, -bound, bound)
        b = jax.random.uniform(kb, (1, fan_out), jnp.float32, -bound, bound)
        return w, b

    w1, b1 = linear(keys[0], keys[1], input_dim, hidden_dim)
    w2, b2 = linear(keys[2], keys[3], hidden_dim, h2)
    w3, b3 = linear(keys[4], keys[5], h2, 4)
    return {"w1": w1, "b1": b1, "w2": w2, "b2": b2, "w3": w3, "b3": b3}


def reference_forward(x, p):
    h1 = jnp.maximum(x @ p["w1"] + p["b1"], 0.0)
    h2 = jnp.maximum(h1 @ p["w2"] + p["b2"], 0.0)
    return h2 @ p["w3"] + p["b3"]


if __name__ == "__main__":
    key = jax.random.PRNGKey(0)
    k_x, k_p, k_b, k_p2, k_x2 = jax.random.split(key, 5)

    # --- Small-shape check (spec shapes at reduced sizes). -----------------
    batch, input_dim, hidden_dim = 2, 16, 32
    x = jax.random.normal(k_x, (batch, input_dim), jnp.float32)
    params = init_params(k_p, input_dim, hidden_dim)
    ref = reference_forward(x, params)

    out_f32 = jax.block_until_ready(
        enhanced_tabular_mlp(x, params, compute_dtype=jnp.float32))
    assert out_f32.shape == (batch, 4), out_f32.shape
    assert jnp.allclose(out_f32, ref, atol=1e-5, rtol=1e-5)

    out_bf16 = jax.block_until_ready(enhanced_tabular_mlp(x, params))  # bf16 default
    assert out_bf16.shape == (batch, 4)
    assert jnp.allclose(out_bf16, ref, atol=1e-1, rtol=1e-1)

    # --- Multi-tile grid + inner chunk loop + ragged last tile (no jnp.pad). ---
    big = 1000   # -> 2 tiles of TB=512, last tile partially masked
    xb = jax.random.normal(k_b, (big, input_dim), jnp.float32)
    refb = reference_forward(xb, params)

    outb_f32 = jax.block_until_ready(
        enhanced_tabular_mlp(xb, params, compute_dtype=jnp.float32))
    assert outb_f32.shape == (big, 4), outb_f32.shape
    assert jnp.allclose(outb_f32, refb, atol=1e-4, rtol=1e-4)

    outb_bf16 = jax.block_until_ready(enhanced_tabular_mlp(xb, params))
    assert outb_bf16.shape == (big, 4)
    assert jnp.allclose(outb_bf16, refb, atol=1e-1, rtol=1e-1)

    # --- Default-width model (hidden=128), larger batch, bf16 default. -----
    params128 = init_params(k_p2, input_dim, 128)
    xl = jax.random.normal(k_x2, (4096, input_dim), jnp.float32)
    refl = reference_forward(xl, params128)
    outl = jax.block_until_ready(enhanced_tabular_mlp(xl, params128))
    assert outl.shape == (4096, 4)
    assert jnp.allclose(outl, refl, atol=1e-1, rtol=1e-1)

    print("KERNEL_OK")
</pallas_src>

<mosaic_0001>
module attributes {stable_mosaic.version = 11 : i64} {
  func.func @mlp_kernel(%arg0: i32, %arg1: memref<2x16xf32, #tpu.memory_space<vmem>>, %arg2: memref<16x32xf32, #tpu.memory_space<vmem>>, %arg3: memref<1x32xf32, #tpu.memory_space<vmem>>, %arg4: memref<32x16xf32, #tpu.memory_space<vmem>>, %arg5: memref<1x16xf32, #tpu.memory_space<vmem>>, %arg6: memref<4x16xf32, #tpu.memory_space<vmem>>, %arg7: memref<1x4xf32, #tpu.memory_space<vmem>>, %arg8: memref<2x4xf32, #tpu.memory_space<vmem>>) attributes {dimension_semantics = [#tpu.dimension_semantics<parallel>], iteration_bounds = array<i64: 1>, scalar_prefetch = 0 : i64, scratch_operands = 0 : i64, tpu.core_type = #tpu.core_type<tc>, window_params = [{transform_indices = @transform_0, window_bounds = array<i64: 2, 16>}, {pipeline_mode = #tpu.pipeline_mode<synchronous>, transform_indices = @transform_1, window_bounds = array<i64: 16, 32>}, {pipeline_mode = #tpu.pipeline_mode<synchronous>, transform_indices = @transform_2, window_bounds = array<i64: 1, 32>}, {pipeline_mode = #tpu.pipeline_mode<synchronous>, transform_indices = @transform_3, window_bounds = array<i64: 32, 16>}, {pipeline_mode = #tpu.pipeline_mode<synchronous>, transform_indices = @transform_4, window_bounds = array<i64: 1, 16>}, {pipeline_mode = #tpu.pipeline_mode<synchronous>, transform_indices = @transform_5, window_bounds = array<i64: 4, 16>}, {pipeline_mode = #tpu.pipeline_mode<synchronous>, transform_indices = @transform_6, window_bounds = array<i64: 1, 4>}, {transform_indices = @transform_7, window_bounds = array<i64: 2, 4>}]} {
    %c0 = arith.constant 0 : index
    %c0_0 = arith.constant 0 : index
    %0 = vector.load %arg2[%c0, %c0_0] : memref<16x32xf32, #tpu.memory_space<vmem>>, vector<16x32xf32>
    %c0_1 = arith.constant 0 : index
    %c0_2 = arith.constant 0 : index
    %1 = vector.load %arg4[%c0_1, %c0_2] : memref<32x16xf32, #tpu.memory_space<vmem>>, vector<32x16xf32>
    %c0_3 = arith.constant 0 : index
    %c0_4 = arith.constant 0 : index
    %2 = vector.load %arg6[%c0_3, %c0_4] : memref<4x16xf32, #tpu.memory_space<vmem>>, vector<4x16xf32>
    %c0_5 = arith.constant 0 : index
    %c0_6 = arith.constant 0 : index
    %3 = vector.load %arg3[%c0_5, %c0_6] : memref<1x32xf32, #tpu.memory_space<vmem>>, vector<1x32xf32>
    %c0_7 = arith.constant 0 : index
    %c0_8 = arith.constant 0 : index
    %4 = vector.load %arg5[%c0_7, %c0_8] : memref<1x16xf32, #tpu.memory_space<vmem>>, vector<1x16xf32>
    %c0_9 = arith.constant 0 : index
    %c0_10 = arith.constant 0 : index
    %5 = vector.load %arg7[%c0_9, %c0_10] : memref<1x4xf32, #tpu.memory_space<vmem>>, vector<1x4xf32>
    %c0_11 = arith.constant 0 : index
    %c0_12 = arith.constant 0 : index
    %6 = vector.load %arg1[%c0_11, %c0_12] : memref<2x16xf32, #tpu.memory_space<vmem>>, vector<2x16xf32>
    %cst = arith.constant dense<0.000000e+00> : vector<2x32xf32>
    %7 = tpu.matmul %6, %0, %cst {dimension_numbers = #tpu.dot_dimension_numbers<[1], [0], [0], [1], [0, 0, 1, 1], [], []>} : vector<2x16xf32>, vector<16x32xf32>, vector<2x32xf32> -> vector<2x32xf32>
    %8 = vector.broadcast %3 : vector<1x32xf32> to vector<2x32xf32>
    %9 = arith.addf %7, %8 : vector<2x32xf32>
    %cst_13 = arith.constant 0.000000e+00 : f32
    %10 = vector.broadcast %cst_13 : f32 to vector<2x32xf32>
    %11 = arith.maximumf %9, %10 : vector<2x32xf32>
    %cst_14 = arith.constant dense<0.000000e+00> : vector<2x16xf32>
    %12 = tpu.matmul %11, %1, %cst_14 {dimension_numbers = #tpu.dot_dimension_numbers<[1], [0], [0], [1], [0, 0, 1, 1], [], []>} : vector<2x32xf32>, vector<32x16xf32>, vector<2x16xf32> -> vector<2x16xf32>
    %13 = vector.broadcast %4 : vector<1x16xf32> to vector<2x16xf32>
    %14 = arith.addf %12, %13 : vector<2x16xf32>
    %cst_15 = arith.constant 0.000000e+00 : f32
    %15 = vector.broadcast %cst_15 : f32 to vector<2x16xf32>
    %16 = arith.maximumf %14, %15 : vector<2x16xf32>
    %17 = vector.extract_strided_slice %2 {offsets = [0, 0], sizes = [1, 16], strides = [1, 1]} : vector<4x16xf32> to vector<1x16xf32>
    %18 = vector.broadcast %17 : vector<1x16xf32> to vector<2x16xf32>
    %19 = arith.mulf %16, %18 : vector<2x16xf32>
    %cst_16 = arith.constant dense<0.000000e+00> : vector<2xf32>
    %20 = vector.multi_reduction <add>, %19, %cst_16 [1] : vector<2x16xf32> to vector<2xf32>
    %21 = vector.shape_cast %20 : vector<2xf32> to vector<2x1xf32>
    %22 = vector.extract_strided_slice %2 {offsets = [1, 0], sizes = [1, 16], strides = [1, 1]} : vector<4x16xf32> to vector<1x16xf32>
    %23 = vector.broadcast %22 : vector<1x16xf32> to vector<2x16xf32>
    %24 = arith.mulf %16, %23 : vector<2x16xf32>
    %cst_17 = arith.constant dense<0.000000e+00> : vector<2xf32>
    %25 = vector.multi_reduction <add>, %24, %cst_17 [1] : vector<2x16xf32> to vector<2xf32>
    %26 = vector.shape_cast %25 : vector<2xf32> to vector<2x1xf32>
    %27 = vector.extract_strided_slice %2 {offsets = [2, 0], sizes = [1, 16], strides = [1, 1]} : vector<4x16xf32> to vector<1x16xf32>
    %28 = vector.broadcast %27 : vector<1x16xf32> to vector<2x16xf32>
    %29 = arith.mulf %16, %28 : vector<2x16xf32>
    %cst_18 = arith.constant dense<0.000000e+00> : vector<2xf32>
    %30 = vector.multi_reduction <add>, %29, %cst_18 [1] : vector<2x16xf32> to vector<2xf32>
    %31 = vector.shape_cast %30 : vector<2xf32> to vector<2x1xf32>
    %32 = vector.extract_strided_slice %2 {offsets = [3, 0], sizes = [1, 16], strides = [1, 1]} : vector<4x16xf32> to vector<1x16xf32>
    %33 = vector.broadcast %32 : vector<1x16xf32> to vector<2x16xf32>
    %34 = arith.mulf %16, %33 : vector<2x16xf32>
    %cst_19 = arith.constant dense<0.000000e+00> : vector<2xf32>
    %35 = vector.multi_reduction <add>, %34, %cst_19 [1] : vector<2x16xf32> to vector<2xf32>
    %36 = vector.shape_cast %35 : vector<2xf32> to vector<2x1xf32>
    %37 = tpu.concatenate %21, %26, %31, %36 in 1 : vector<2x1xf32>, vector<2x1xf32>, vector<2x1xf32>, vector<2x1xf32> -> vector<2x4xf32>
    %38 = vector.broadcast %5 : vector<1x4xf32> to vector<2x4xf32>
    %39 = arith.addf %37, %38 : vector<2x4xf32>
    %c0_20 = arith.constant 0 : index
    %c0_21 = arith.constant 0 : index
    %40 = vector.load %arg8[%c0_20, %c0_21] : memref<2x4xf32, #tpu.memory_space<vmem>>, vector<2x4xf32>
    tpu.vector_store %arg8[%c0_20, %c0_21], %39 {strides = array<i32>} : memref<2x4xf32, #tpu.memory_space<vmem>>, vector<2x4xf32>,
    return
  }
  func.func @transform_0(%arg0: i32) -> (i32, i32) {
    %c0_i32 = arith.constant 0 : i32
    %c0_i32_0 = arith.constant 0 : i32
    return %arg0, %c0_i32 : i32, i32
  }
  func.func @transform_1(%arg0: i32) -> (i32, i32) {
    %c0_i32 = arith.constant 0 : i32
    %c0_i32_0 = arith.constant 0 : i32
    %c0_i32_1 = arith.constant 0 : i32
    return %c0_i32, %c0_i32_0 : i32, i32
  }
  func.func @transform_2(%arg0: i32) -> (i32, i32) {
    %c0_i32 = arith.constant 0 : i32
    %c0_i32_0 = arith.constant 0 : i32
    %c0_i32_1 = arith.constant 0 : i32
    return %c0_i32, %c0_i32_0 : i32, i32
  }
  func.func @transform_3(%arg0: i32) -> (i32, i32) {
    %c0_i32 = arith.constant 0 : i32
    %c0_i32_0 = arith.constant 0 : i32
    %c0_i32_1 = arith.constant 0 : i32
    return %c0_i32, %c0_i32_0 : i32, i32
  }
  func.func @transform_4(%arg0: i32) -> (i32, i32) {
    %c0_i32 = arith.constant 0 : i32
    %c0_i32_0 = arith.constant 0 : i32
    %c0_i32_1 = arith.constant 0 : i32
    return %c0_i32, %c0_i32_0 : i32, i32
  }
  func.func @transform_5(%arg0: i32) -> (i32, i32) {
    %c0_i32 = arith.constant 0 : i32
    %c0_i32_0 = arith.constant 0 : i32
    %c0_i32_1 = arith.constant 0 : i32
    return %c0_i32, %c0_i32_0 : i32, i32
  }
  func.func @transform_6(%arg0: i32) -> (i32, i32) {
    %c0_i32 = arith.constant 0 : i32
    %c0_i32_0 = arith.constant 0 : i32
    %c0_i32_1 = arith.constant 0 : i32
    return %c0_i32, %c0_i32_0 : i32, i32
  }
  func.func @transform_7(%arg0: i32) -> (i32, i32) {
    %c0_i32 = arith.constant 0 : i32
    %c0_i32_0 = arith.constant 0 : i32
    return %arg0, %c0_i32 : i32, i32
  }
}

</mosaic_0001>

<bundles_post_ra>
// kernel: enhanced_tabular_mlp.1
= control target key start
LH: loop header
LB: loop body
LE: loop exit
PB: predicated region body
PF: predicated region fallthrough
CT: control target
= control target key end

     0   :  { %v330_v2 = vmov 0.0|0.0   ;;  %vm331_vm0 = vmmov 0   ;;  %v332_v4 = vmov 0.0   ;;  %s419_s0 = inlined_call_operand.vmem [shape: f32[2,16], index: 0, kind: input, shape index: {}]   ;;  %s420_s1 = inlined_call_operand.vmem [shape: f32[16,32], index: 1, kind: input, shape index: {}]   ;;  %s421_s2 = inlined_call_operand.vmem [shape: f32[1,32], index: 2, kind: input, shape index: {}]   ;;  %s422_s3 = inlined_call_operand.vmem [shape: f32[32,16], index: 3, kind: input, shape index: {}]   ;;  %s423_s4 = inlined_call_operand.vmem [shape: f32[1,16], index: 4, kind: input, shape index: {}]   ;;  %s424_s5 = inlined_call_operand.vmem [shape: f32[4,16], index: 5, kind: input, shape index: {}]   ;;  %s425_s6 = inlined_call_operand.vmem [shape: f32[1,4], index: 6, kind: input, shape index: {}]   ;;  %s426_s7 = inlined_call_operand.hbm [shape: f32[2,4], index: 7, kind: output, shape index: {}]  }
   0x1   :  { %v27_v0 = vld [vmem:[%s420_s1] sm:$0xff]  ;;  %v28_v1 = vld [vmem:[%s420_s1 + $0x8] sm:$0xff]  ;;  %293 = vmatprep.subr.bf16.mxu0 %v330_v2  ;;  %279 = vmatprep.mubr.msk.f32.mxu0 %vm331_vm0, %v332_v4 }
   0x2   :  { %v294_v3 = vpack.c.bf16 %v28_v1, %v27_v0  ;;  %v29_v5 = vld [vmem:[%s422_s3] sm:$0xff]  ;;  %v30_v6 = vld [vmem:[%s422_s3 + $0x8] sm:$0xff]  ;;  %296 = vmatprep.subr.bf16.mxu1 %v330_v2  ;;  %290 = vmatprep.mubr.msk.f32.mxu1 %vm331_vm0, %v332_v4 }
   0x3   :  { %v297_v7 = vpack.c.bf16 %v30_v6, %v29_v5 }
   0x4   :  { %12 = vsyncpa [#allocation3], 0  ;;  %295 = vmatpush3.bf16.msra.mxu0 %v294_v3  ;;  %v37_v8 = vld [vmem:[%s419_s0] sm:$0x3]  ;;  %vm44_vm1 = vcmask 130048   ;;  %v31_v9 = vld [vmem:[%s422_s3 + $0x10] sm:$0xff]  ;;  %v200_v17 = vlaneseq }
   0x5   :  { %298 = vmatpush3.bf16.msra.mxu1 %v297_v7  ;;  %v32_v10 = vld [vmem:[%s422_s3 + $0x18] sm:$0xff]  ;;  %v262_v12 = vld [vmem:[%s421_s2] ss:$0 sm:$0xff]  ;;  %vm125_vm2 = vcmask 261120   ;;  %vm205_vm3 = vcmask 123904   ;;  %vm233_vm4 = vcmask 7168  }
   0x6   :  { %299 = vmatprep.subr.bf16.mxu1 %v330_v2  ;;  %v300_v11 = vpack.c.bf16 %v32_v10, %v31_v9  ;;  %v201_v18 = vshrl.u32 %v200_v17, 7  ;;  %v264_v21 = vld [vmem:[%s423_s4] ss:$0 sm:$0xff]  ;;  %vm235_vm5 = vcmask 15360   ;;  %vm237_vm6 = vcmask 23552  }
   0x7   :  { %280 = vmatmul.mubr.msk.f32.vlgmr.msra.gmra.mrb[0].mxu0 %vm44_vm1, %v37_v8  ;;  %v33_v22 = vld [vmem:[%s424_s5] sm:$0xf]  ;;  %s333_s5 = smov [#allocation2]   ;;  %vm246_vm7 = vcmask 25600  }
   0x8   :  { %v219_v19 = vsub.s32 2, %v201_v18  ;;  %v202_v20 = vsub.s32 0, %v201_v18  ;;  %v227_v23 = vsub.s32 3, %v201_v18  ;;  %v211_v24 = vsub.s32 1, %v201_v18  ;;  %v266_v45 = vld [vmem:[%s425_s6] ss:$0 sm:$0xff] }
   0x9   :  { %301 = vmatpush3.bf16.msra.mxu1 %v300_v11  ;;  %s254_s18 = sshll.u32 %s333_s5, 4  ;;  %s255_s18 = int_to_ptr.vmem [resolvable:$true] %s254_s18 }
   0xa   :  { %v220_v28 = vrot.slane %v33_v22, %v219_v19  ;;  %v203_v29 = vrot.slane %v33_v22, %v202_v20  ;;  %v228_v31 = vrot.slane %v33_v22, %v227_v23  ;;  %v212_v32 = vrot.slane %v33_v22, %v211_v24  ;;  %s306_s19 = scalar_lea.vmem %s255_s18, 32  ;;  %p311_p1 = scmp.lt.s32.totalorder %s255_s18, %s255_s18 }
   0xb   :  { %p307_p0 = scmp.ne.s32.totalorder %s255_s18, %s306_s19  ;;  %p312_p2 = scmp.lt.s32.totalorder %s306_s19, %s306_s19 }
   0xd   :  { %p313_p3 = por %p312_p2, %p311_p1 }
   0xf   :  { %p314_p4 = pnand %p313_p3, %p307_p0 }
  0xda   :  { %v114_v13 = vpop.f32.mrb[0].mxu0 }
  0xdb   :  { %v115_v14 = vadd.f32 %v262_v12, %v114_v13  ;;  %v281_v15 = vpop.f32.mrb[1].mxu0 }
  0xdd   :  { %v118_v16 = vmax.f32 %v115_v14, 0.0 }
  0xdf   :  { %291 = vmatmul.mubr.msk.f32.vlgmr.msra.gmra.mrb[0].mxu1 %vm125_vm2, %v118_v16 }
 0x1b2   :  { %v195_v25 = vpop.f32.mrb[0].mxu1 }
 0x1b3   :  { %v196_v26 = vadd.f32 %v264_v21, %v195_v25  ;;  %v292_v27 = vpop.f32.mrb[1].mxu1 }
 0x1b5   :  { %v199_v30 = vmax.f32 %v196_v26, 0.0 }
 0x1b7   :  { %v221_v33 = vmul.f32 %v220_v28, %v199_v30  ;;  %v204_v34 = vmul.f32 %v203_v29, %v199_v30  ;;  %v229_v37 = vmul.f32 %v228_v31, %v199_v30  ;;  %v213_v38 = vmul.f32 %v212_v32, %v199_v30 }
 0x1b9   :  { %v222_v35 = vsel %vm205_vm3, %v221_v33, 0.0  ;;  %v206_v36 = vsel %vm205_vm3, %v204_v34, 0.0  ;;  %v230_v39 = vsel %vm205_vm3, %v229_v37, 0.0  ;;  %v214_v40 = vsel %vm205_vm3, %v213_v38, 0.0 }
 0x1ba   :  { %223 = vadd.xlane.f32.xlu1 %v222_v35  ;;  %207 = vadd.xlane.f32.xlu0 %v206_v36 }
 0x1be   :  { %231 = vadd.xlane.f32.xlu1 %v230_v39  ;;  %215 = vadd.xlane.f32.xlu0 %v214_v40 }
 0x247   :  { %v224_v41 = vpop.xlane.xlu1 %223  ;;  %v208_v42 = vpop.xlane.xlu0 %207 }
 0x24b   :  { %v216_v43 = vpop.xlane.xlu0 %215  ;;  %v232_v46 = vpop.xlane.xlu1 %231 }
 0x24c   :  { %v234_v44 = vsel %vm233_vm4, %v208_v42, %v216_v43 }
 0x24d   :  { %v236_v47 = vsel %vm235_vm5, %v234_v44, %v224_v41 }
 0x24e   :  { %v238_v48 = vsel %vm237_vm6, %v236_v47, %v232_v46 }
 0x24f   :  { %v245_v49 = vadd.f32 %v266_v45, %v238_v48 }
 0x251   :  { %247 = vst.msk [vmem:[#allocation2] sm:$0x3] %vm246_vm7, %v245_v49 }
 0x252   :  { %317 = shalt.err (!%p314_p4)
}
 0x253   :  { %s318_s6 = scalar_lea.hbm %s426_s7, 32 }
 0x254   :  { %p319_p5 = scmp.ne.s32.totalorder %s426_s7, %s318_s6  ;;  %p322_p6 = scmp.lt.u32.totalorder %s318_s6, %s426_s7 }
 0x256   :  { %p324_p7 = pnand %p322_p6, %p319_p5 }
 0x258   :  { %327 = shalt.err (!%p324_p7)
}
 0x259   :  { %257 = dma.vmem_to_hbm [thread:$0]  %s255_s18, 32, %s426_s7, [#allocation3]  }
 0x25a   :  { %328 = dma.done.wait [#allocation3], 32  }
 0x25b   :  { %329 = vsyncadd [#allocation3], 4294967264 }
 0x25c   :  { %261 = vsyncpa [#allocation3], 1 }

</bundles_post_ra>
